<compile_context>
chip_gen: v6e
topology: v6e:2x2x1
jax: 0.10.0
libtpu: 0.0.40
codegen_flags: <defaults>
</compile_context>

<pallas_src>
import functools
import math
from typing import NamedTuple, Optional

import numpy as np

import jax
import jax.numpy as jnp
from jax.experimental import pallas as pl
from jax.experimental.pallas import tpu as pltpu


_LANE = 128
_SUBLANE = 8
_MAX_L = 4096                      # cap on packed-row width (lanes)
_ROW_BUDGET = 24 * 1024 * 1024     # VMEM budget for row-scaled buffers + in-kernel temps
_VMEM_LIMIT = 32 * 1024 * 1024     # explicit scoped-VMEM limit (v5e default is only 16 MiB)


def _round_up(x: int, m: int) -> int:
    return -(-x // m) * m


def _choose_pack(per_pixel: int) -> int:
    """Pixels packed per row so each row is a whole number of 128-lane vregs."""
    p = _LANE // math.gcd(per_pixel, _LANE)
    if p * per_pixel <= _MAX_L:
        return p
    # Rare fallback (awkward texture sizes): keep the row <= 128 lanes (masked stores).
    return max(1, _LANE // per_pixel)


def _bf16_round_np(x: np.ndarray) -> np.ndarray:
    """Round-to-nearest-even f32 -> bf16 -> f32, in numpy (for the hi/lo split)."""
    u = np.asarray(x, np.float32).view(np.uint32).astype(np.uint64)
    r = ((u + 0x7FFF + ((u >> 16) & 1)) & 0xFFFF0000).astype(np.uint32)
    return r.view(np.float32)


def _lighting_kernel(nrm_ref, tex_ref, mhi_ref, mlo_ref, ab_ref, out_ref):
    # nrm_ref: (tr, 3P)   tex_ref/out_ref: (tr, P*3T)
    # mhi/mlo: (3P, P*3T) bf16 constant operator   ab_ref: (2, P*3T) f32 constants
    n = nrm_ref[...].astype(jnp.float32)
    n_hi = n.astype(jnp.bfloat16)                              # exactly representable
    n_lo = (n - n_hi.astype(jnp.float32)).astype(jnp.bfloat16)
    # One small constant matmul performs, for every pixel packed in a row, BOTH the
    # dot(normal, light_direction) and its broadcast onto that pixel's 3T lanes.
    # Three plain bf16 passes with hi/lo compensation give f32-grade accuracy at
    # half the MXU cost of Precision.HIGHEST (keeps v5e HBM-bound).
    cos = jnp.dot(n_hi, mhi_ref[...], preferred_element_type=jnp.float32)
    cos = cos + jnp.dot(n_lo, mhi_ref[...], preferred_element_type=jnp.float32)
    cos = cos + jnp.dot(n_hi, mlo_ref[...], preferred_element_type=jnp.float32)
    cos = jnp.maximum(cos, 0.0)
    light = ab_ref[0:1, :] + ab_ref[1:2, :] * cos              # (tr, L), pure VPU
    out_ref[...] = (tex_ref[...].astype(jnp.float32) * light).astype(out_ref.dtype)


@functools.partial(jax.jit, static_argnames=("params",))
def _lighting_forward(textures, normals, params):
    ia, ca, idir, cd, direction = params

    if textures.ndim == 4:            # surface textures: [B, N, T, 3]
        B, N, T, C = textures.shape
    elif textures.ndim == 3:          # vertex textures: [B, N, 3]
        B, N, C = textures.shape
        T = 1
    else:
        raise ValueError(f"unexpected textures shape {textures.shape}")
    assert C == 3 and normals.shape == (B, N, 3)

    per_pixel = 3 * T                 # values stored per pixel (t-major, rgb-minor)
    total = B * N
    P = _choose_pack(per_pixel)       # pixels packed per row
    L = P * per_pixel                 # lanes per packed row (multiple of 128)
    K = 3 * P                         # normal components per packed row

    # Flatten to one pixel per row (contiguous reshape, no transpose) and pad so the
    # pixel count divides P instead of silently degrading to a narrow masked layout.
    tex_flat = textures.reshape(total, per_pixel)
    nrm_flat = normals.reshape(total, 3)
    pad = (-total) % P
    if pad:
        # TODO(synk): split off the ragged tail instead of padding (pad copies once).
        tex_flat = jnp.pad(tex_flat, ((0, pad), (0, 0)))
        nrm_flat = jnp.pad(nrm_flat, ((0, pad), (0, 0)))
    total_p = total + pad
    R = total_p // P                  # packed rows
    tex2 = tex_flat.reshape(R, L)
    nrm2 = nrm_flat.reshape(R, K)

    # Constant dot+broadcast operator: M[k, j] = d[k%3] * (k//3 == j//(3T)),
    # split into an exactly-bf16 hi part and a bf16 residual for the compensated dot.
    d = np.asarray(direction, np.float32)
    m = np.zeros((K, L), np.float32)
    for p_ in range(P):
        m[3 * p_:3 * p_ + 3, p_ * per_pixel:(p_ + 1) * per_pixel] = d[:, None]
    m_hi = _bf16_round_np(m)
    m_lo = m - m_hi
    mhi_op = jnp.asarray(m_hi, dtype=jnp.bfloat16)     # lossless (already bf16 grid)
    mlo_op = jnp.asarray(m_lo, dtype=jnp.bfloat16)

    # A[j] = ia*ca[j%3], B[j] = id*cd[j%3] -- tiny (2, L) constant row.
    amb = np.tile(np.asarray(ca, np.float32) * np.float32(ia), P * T)
    dif = np.tile(np.asarray(cd, np.float32) * np.float32(idir), P * T)
    ab_op = jnp.asarray(np.stack([amb, dif]))

    # Tile rows: as large as fits a ~24 MiB budget (double-buffered tex in/out,
    # normals, in-kernel f32 temps, plus the constant operands), rounded to the
    # sublane multiple.  Keep >= 2 grid steps when possible (v7x has 2 TensorCores).
    t_item = np.dtype(textures.dtype).itemsize
    n_item = np.dtype(normals.dtype).itemsize
    row_bytes = 2 * (2 * L * t_item + K * n_item) + 3 * L * 4 + 3 * K * 4
    const_bytes = 2 * (2 * K * L * 2) + 2 * (2 * L * 4)
    budget = max(_ROW_BUDGET - const_bytes, 1 << 20)
    tr_budget = max(_SUBLANE, (budget // row_bytes) // _SUBLANE * _SUBLANE)
    if R >= 2 * _SUBLANE:
        tr = int(min(tr_budget, _round_up(pl.cdiv(R, 2), _SUBLANE)))
    else:
        tr = R
    grid = (pl.cdiv(R, tr),)

    cost = pl.CostEstimate(
        flops=int(3 * 2 * R * K * L + 4 * R * L),
        transcendentals=0,
        bytes_accessed=int(2 * R * L * t_item + R * K * n_item
                           + 2 * K * L * 2 + 2 * L * 4),
    )

    out2 = pl.pallas_call(
        _lighting_kernel,
        out_shape=jax.ShapeDtypeStruct((R, L), textures.dtype),
        grid=grid,
        in_specs=[
            pl.BlockSpec((tr, K), lambda i: (i, 0)),   # packed normals
            pl.BlockSpec((tr, L), lambda i: (i, 0)),   # packed textures
            pl.BlockSpec((K, L), lambda i: (0, 0)),    # constant operator (hi, bf16)
            pl.BlockSpec((K, L), lambda i: (0, 0)),    # constant operator (lo, bf16)
            pl.BlockSpec((2, L), lambda i: (0, 0)),    # ambient / diffuse constants
        ],
        out_specs=pl.BlockSpec((tr, L), lambda i: (i, 0)),
        compiler_params=pltpu.CompilerParams(
            dimension_semantics=("parallel",),
            vmem_limit_bytes=_VMEM_LIMIT),
        cost_estimate=cost,
    )(nrm2, tex2, mhi_op, mlo_op, ab_op)

    out_flat = out2.reshape(total_p, per_pixel)
    if pad:
        out_flat = out_flat[:total]
    return out_flat.reshape(textures.shape)


class Mesh(NamedTuple):
    vertices: jax.Array
    faces: jax.Array
    textures: jax.Array
    texture_res: int
    texture_type: str
    surface_normals: Optional[jax.Array] = None
    vertex_normals: Optional[jax.Array] = None


class Lighting:
    """JAX/Pallas port of metaras.Lighting (forward only)."""

    def __init__(self, intensity_ambient=0.5, color_ambient=(1, 1, 1),
                 intensity_directionals=0.5, color_directionals=(1, 1, 1),
                 directions=(0, 1, 0)):
        self.params = (
            float(intensity_ambient),
            tuple(float(c) for c in color_ambient),
            float(intensity_directionals),
            tuple(float(c) for c in color_directionals),
            tuple(float(v) for v in directions),
        )

    def __call__(self, mesh: Mesh) -> Mesh:
        if mesh.texture_type == "surface":
            new_textures = _lighting_forward(mesh.textures, mesh.surface_normals,
                                             self.params)
        elif mesh.texture_type == "vertex":
            new_textures = _lighting_forward(mesh.textures, mesh.vertex_normals,
                                             self.params)
        else:
            raise ValueError(mesh.texture_type)
        return Mesh(mesh.vertices, mesh.faces, new_textures,
                    mesh.texture_res, mesh.texture_type,
                    mesh.surface_normals, mesh.vertex_normals)


def _reference(textures, normals, params):
    ia, ca, idir, cd, direction = params
    ca = jnp.asarray(ca, jnp.float32)
    cd = jnp.asarray(cd, jnp.float32)
    d = jnp.asarray(direction, jnp.float32)
    # elementwise multiply + sum keeps the reference in exact f32 (no MXU rounding)
    cos = jax.nn.relu(jnp.sum(normals.astype(jnp.float32) * d, axis=-1))
    light = ia * ca[None, None, :] + idir * cd[None, None, :] * cos[:, :, None]
    if textures.ndim == 4:
        return textures * light[:, :, None, :]
    return textures * light


if __name__ == "__main__":
    key = jax.random.PRNGKey(0)
    B, Nf, Nv, texture_res = 2, 128, 128, 2
    T = texture_res ** 2

    k1, k2, k3, k4, k5, k6, k7, k8 = jax.random.split(key, 8)
    vertices = jax.random.normal(k1, (B, Nv, 3), dtype=jnp.float32)
    faces = jax.random.randint(k2, (B, Nf, 3), 0, Nv, dtype=jnp.int32)

    lighting = Lighting(intensity_ambient=0.4, color_ambient=(1.0, 0.8, 0.6),
                        intensity_directionals=0.6, color_directionals=(0.9, 1.0, 0.7),
                        directions=(0.3, 0.8, 0.5))

    def _check(got, ref):
        assert got.shape == ref.shape
        err = float(jnp.max(jnp.abs(got.astype(jnp.float32) - ref.astype(jnp.float32))))
        assert err < 1e-4, err

    # ---------------- surface-texture path ----------------
    tex_s = jax.random.uniform(k3, (B, Nf, T, 3), dtype=jnp.float32)
    n_s = jax.random.normal(k4, (B, Nf, 3), dtype=jnp.float32)
    n_s = n_s / jnp.linalg.norm(n_s, axis=-1, keepdims=True)
    mesh_s = Mesh(vertices=vertices, faces=faces, textures=tex_s,
                  texture_res=texture_res, texture_type="surface",
                  surface_normals=n_s)
    out_s = lighting(mesh_s)
    got_s = jax.block_until_ready(out_s.textures)
    _check(got_s, _reference(tex_s, n_s, lighting.params))

    # ---------------- vertex-texture path ----------------
    tex_v = jax.random.uniform(k5, (B, Nv, 3), dtype=jnp.float32)
    n_v = jax.random.normal(k6, (B, Nv, 3), dtype=jnp.float32)
    n_v = n_v / jnp.linalg.norm(n_v, axis=-1, keepdims=True)
    mesh_v = Mesh(vertices=vertices, faces=faces, textures=tex_v,
                  texture_res=texture_res, texture_type="vertex",
                  vertex_normals=n_v)
    out_v = lighting(mesh_v)
    got_v = jax.block_until_ready(out_v.textures)
    _check(got_v, _reference(tex_v, n_v, lighting.params))

    # -------- odd face count (exercises the padded packing path) --------
    Nf_odd = 100
    tex_o = jax.random.uniform(k7, (1, Nf_odd, T, 3), dtype=jnp.float32)
    n_o = jax.random.normal(k8, (1, Nf_odd, 3), dtype=jnp.float32)
    n_o = n_o / jnp.linalg.norm(n_o, axis=-1, keepdims=True)
    mesh_o = Mesh(vertices=vertices[:1], faces=faces[:1], textures=tex_o,
                  texture_res=texture_res, texture_type="surface",
                  surface_normals=n_o)
    out_o = lighting(mesh_o)
    got_o = jax.block_until_ready(out_o.textures)
    _check(got_o, _reference(tex_o, n_o, lighting.params))

    print("KERNEL_OK")
</pallas_src>

<mosaic_0001>
module attributes {stable_mosaic.version = 11 : i64} {
  func.func @_lighting_kernel(%arg0: i32, %arg1: memref<8x96xf32, #tpu.memory_space<vmem>>, %arg2: memref<8x384xf32, #tpu.memory_space<vmem>>, %arg3: memref<96x384xbf16, #tpu.memory_space<vmem>>, %arg4: memref<96x384xbf16, #tpu.memory_space<vmem>>, %arg5: memref<2x384xf32, #tpu.memory_space<vmem>>, %arg6: memref<8x384xf32, #tpu.memory_space<vmem>>) attributes {dimension_semantics = [#tpu.dimension_semantics<parallel>], iteration_bounds = array<i64: 1>, scalar_prefetch = 0 : i64, scratch_operands = 0 : i64, tpu.core_type = #tpu.core_type<tc>, window_params = [{transform_indices = @transform_0, window_bounds = array<i64: 8, 96>}, {transform_indices = @transform_1, window_bounds = array<i64: 8, 384>}, {pipeline_mode = #tpu.pipeline_mode<synchronous>, transform_indices = @transform_2, window_bounds = array<i64: 96, 384>}, {pipeline_mode = #tpu.pipeline_mode<synchronous>, transform_indices = @transform_3, window_bounds = array<i64: 96, 384>}, {pipeline_mode = #tpu.pipeline_mode<synchronous>, transform_indices = @transform_4, window_bounds = array<i64: 2, 384>}, {transform_indices = @transform_5, window_bounds = array<i64: 8, 384>}]} {
    %c0 = arith.constant 0 : index
    %c0_0 = arith.constant 0 : index
    %0 = vector.load %arg1[%c0, %c0_0] : memref<8x96xf32, #tpu.memory_space<vmem>>, vector<8x96xf32>
    %1 = arith.truncf %0 : vector<8x96xf32> to vector<8x96xbf16>
    %2 = arith.extf %1 : vector<8x96xbf16> to vector<8x96xf32>
    %3 = arith.subf %0, %2 : vector<8x96xf32>
    %4 = arith.truncf %3 : vector<8x96xf32> to vector<8x96xbf16>
    %c0_1 = arith.constant 0 : index
    %c0_2 = arith.constant 0 : index
    %5 = vector.load %arg3[%c0_1, %c0_2] : memref<96x384xbf16, #tpu.memory_space<vmem>>, vector<96x384xbf16>
    %cst = arith.constant dense<0.000000e+00> : vector<8x384xf32>
    %6 = tpu.matmul %1, %5, %cst {dimension_numbers = #tpu.dot_dimension_numbers<[1], [0], [0], [1], [0, 0, 1, 1], [], []>} : vector<8x96xbf16>, vector<96x384xbf16>, vector<8x384xf32> -> vector<8x384xf32>
    %c0_3 = arith.constant 0 : index
    %c0_4 = arith.constant 0 : index
    %7 = vector.load %arg3[%c0_3, %c0_4] : memref<96x384xbf16, #tpu.memory_space<vmem>>, vector<96x384xbf16>
    %cst_5 = arith.constant dense<0.000000e+00> : vector<8x384xf32>
    %8 = tpu.matmul %4, %7, %cst_5 {dimension_numbers = #tpu.dot_dimension_numbers<[1], [0], [0], [1], [0, 0, 1, 1], [], []>} : vector<8x96xbf16>, vector<96x384xbf16>, vector<8x384xf32> -> vector<8x384xf32>
    %9 = arith.addf %6, %8 : vector<8x384xf32>
    %c0_6 = arith.constant 0 : index
    %c0_7 = arith.constant 0 : index
    %10 = vector.load %arg4[%c0_6, %c0_7] : memref<96x384xbf16, #tpu.memory_space<vmem>>, vector<96x384xbf16>
    %cst_8 = arith.constant dense<0.000000e+00> : vector<8x384xf32>
    %11 = tpu.matmul %1, %10, %cst_8 {dimension_numbers = #tpu.dot_dimension_numbers<[1], [0], [0], [1], [0, 0, 1, 1], [], []>} : vector<8x96xbf16>, vector<96x384xbf16>, vector<8x384xf32> -> vector<8x384xf32>
    %12 = arith.addf %9, %11 : vector<8x384xf32>
    %cst_9 = arith.constant 0.000000e+00 : f32
    %13 = vector.broadcast %cst_9 : f32 to vector<8x384xf32>
    %14 = arith.maximumf %12, %13 : vector<8x384xf32>
    %c0_10 = arith.constant 0 : index
    %c0_11 = arith.constant 0 : index
    %15 = vector.load %arg5[%c0_10, %c0_11] : memref<2x384xf32, #tpu.memory_space<vmem>>, vector<1x384xf32>
    %c1 = arith.constant 1 : index
    %c0_12 = arith.constant 0 : index
    %16 = vector.load %arg5[%c1, %c0_12] : memref<2x384xf32, #tpu.memory_space<vmem>>, vector<1x384xf32>
    %17 = vector.broadcast %16 : vector<1x384xf32> to vector<8x384xf32>
    %18 = arith.mulf %17, %14 : vector<8x384xf32>
    %19 = vector.broadcast %15 : vector<1x384xf32> to vector<8x384xf32>
    %20 = arith.addf %19, %18 : vector<8x384xf32>
    %c0_13 = arith.constant 0 : index
    %c0_14 = arith.constant 0 : index
    %21 = vector.load %arg2[%c0_13, %c0_14] : memref<8x384xf32, #tpu.memory_space<vmem>>, vector<8x384xf32>
    %22 = arith.mulf %21, %20 : vector<8x384xf32>
    %c0_15 = arith.constant 0 : index
    %c0_16 = arith.constant 0 : index
    %23 = vector.load %arg6[%c0_15, %c0_16] : memref<8x384xf32, #tpu.memory_space<vmem>>, vector<8x384xf32>
    tpu.vector_store %arg6[%c0_15, %c0_16], %22 {strides = array<i32>} : memref<8x384xf32, #tpu.memory_space<vmem>>, vector<8x384xf32>,
    return
  }
  func.func @transform_0(%arg0: i32) -> (i32, i32) {
    %c0_i32 = arith.constant 0 : i32
    %c0_i32_0 = arith.constant 0 : i32
    return %arg0, %c0_i32 : i32, i32
  }
  func.func @transform_1(%arg0: i32) -> (i32, i32) {
    %c0_i32 = arith.constant 0 : i32
    %c0_i32_0 = arith.constant 0 : i32
    return %arg0, %c0_i32 : i32, i32
  }
  func.func @transform_2(%arg0: i32) -> (i32, i32) {
    %c0_i32 = arith.constant 0 : i32
    %c0_i32_0 = arith.constant 0 : i32
    %c0_i32_1 = arith.constant 0 : i32
    return %c0_i32, %c0_i32_0 : i32, i32
  }
  func.func @transform_3(%arg0: i32) -> (i32, i32) {
    %c0_i32 = arith.constant 0 : i32
    %c0_i32_0 = arith.constant 0 : i32
    %c0_i32_1 = arith.constant 0 : i32
    return %c0_i32, %c0_i32_0 : i32, i32
  }
  func.func @transform_4(%arg0: i32) -> (i32, i32) {
    %c0_i32 = arith.constant 0 : i32
    %c0_i32_0 = arith.constant 0 : i32
    %c0_i32_1 = arith.constant 0 : i32
    return %c0_i32, %c0_i32_0 : i32, i32
  }
  func.func @transform_5(%arg0: i32) -> (i32, i32) {
    %c0_i32 = arith.constant 0 : i32
    %c0_i32_0 = arith.constant 0 : i32
    return %arg0, %c0_i32 : i32, i32
  }
}

</mosaic_0001>

<bundles_post_ra>
// kernel: _lighting_forward.1
= control target key start
LH: loop header
LB: loop body
LE: loop exit
PB: predicated region body
PF: predicated region fallthrough
CT: control target
= control target key end

     0   :  { %v739_v0 = vmov 0.0   ;;  %vm740_vm0 = vmmov 0   ;;  %v741_v3 = vmov 0   ;;  %vm146_vm1 = vcmask 785408   ;;  %s947_s2 = inlined_call_operand.vmem [shape: bf16[96,384], index: 2, kind: input, shape index: {}]   ;;  %s948_s0 = inlined_call_operand.vmem [shape: f32[8,96], index: 0, kind: input, shape index: {}]   ;;  %s949_s3 = inlined_call_operand.vmem [shape: bf16[96,384], index: 3, kind: input, shape index: {}]   ;;  %s950_s4 = inlined_call_operand.vmem [shape: f32[2,384], index: 4, kind: input, shape index: {}]   ;;  %s951_s1 = inlined_call_operand.vmem [shape: f32[8,384], index: 1, kind: input, shape index: {}]   ;;  %s952_s5 = inlined_call_operand.vmem [shape: f32[8,384], index: 5, kind: output, shape index: {}]  }
   0x1   :  { %640 = vmatprep.subr.bf16.mxu1 %v739_v0  ;;  %v691_v1 = vld [vmem:[%s947_s2 + $0x7c] ss:$12 sps:$4 sm:$0xff]   ;;  %652 = vmatprep.mubr.msk.bf16.mxu1 %vm740_vm0, %v739_v0  ;;  %v693_v2 = vld [vmem:[%s947_s2 + $0x80] ss:$12 sps:$4 sm:$0xff]   ;;  %v694_v4 = vld [vmem:[%s947_s2 + $0x78] ss:$12 sps:$4 sm:$0xff]   ;;  %v526_v59 = vlaneseq }
   0x2   :  { %182 = vmatprep.mubr.bf16.mxu0 %v741_v3  ;;  %154 = vmatprep.subr.bf16.mxu0 %v691_v1  ;;  %v695_v5 = vld [vmem:[%s947_s2 + $0x64] ss:$12 sps:$4 sm:$0xff]   ;;  %v697_v6 = vld [vmem:[%s947_s2 + $0x68] ss:$12 sps:$4 sm:$0xff]   ;;  %v698_v7 = vld [vmem:[%s947_s2 + $0x60] ss:$12 sps:$4 sm:$0xff]  }
   0x3   :  { %641 = vmatpush3.bf16.msra.mxu1 %v693_v2  ;;  %155 = vmatpush1.bf16.msra.mxu0 %v694_v4  ;;  %v699_v8 = vld [vmem:[%s947_s2 + $0x4c] ss:$12 sps:$4 sm:$0xff]   ;;  %v701_v9 = vld [vmem:[%s947_s2 + $0x50] ss:$12 sps:$4 sm:$0xff]   ;;  %v702_v10 = vld [vmem:[%s947_s2 + $0x48] ss:$12 sps:$4 sm:$0xff]  }
   0x4   :  { %642 = vmatprep.subr.bf16.mxu1 %v739_v0  ;;  %156 = vmatprep.subr.bf16.mxu0 %v695_v5  ;;  %v703_v11 = vld [vmem:[%s947_s2 + $0x34] ss:$12 sps:$4 sm:$0xff]   ;;  %v705_v12 = vld [vmem:[%s947_s2 + $0x38] ss:$12 sps:$4 sm:$0xff]   ;;  %v706_v13 = vld [vmem:[%s947_s2 + $0x30] ss:$12 sps:$4 sm:$0xff]  }
   0x5   :  { %v707_v14 = vld [vmem:[%s947_s2 + $0x1c] ss:$12 sps:$4 sm:$0xff]   ;;  %v21_v15 = vld [vmem:[%s948_s0] sm:$0xff]  ;;  %v725_v31 = vld [vmem:[%s949_s3 + $0x4c] ss:$12 sps:$4 sm:$0xff]   ;;  %v527_v60 = vshrl.u32 %v526_v59, 7 }
   0x6   :  { %v709_v16 = vld [vmem:[%s947_s2 + $0x20] ss:$12 sps:$4 sm:$0xff]   ;;  %v824_v17 = vpack.c.bf16 %v21_v15, %v21_v15  ;;  %v710_v18 = vld [vmem:[%s947_s2 + $0x18] ss:$12 sps:$4 sm:$0xff]   ;;  %v713_v21 = vld [vmem:[%s947_s2 + $0x8] ss:$12 sps:$4 sm:$0xff]  }
   0x7   :  { %643 = vmatpush3.bf16.msra.mxu1 %v697_v6  ;;  %157 = vmatpush1.bf16.msra.mxu0 %v698_v7  ;;  %v711_v19 = vld [vmem:[%s947_s2 + $0x4] ss:$12 sps:$4 sm:$0xff]   ;;  %v714_v23 = vld [vmem:[%s947_s2] ss:$12 sps:$4 sm:$0xff]   ;;  %v717_v25 = vld [vmem:[%s949_s3 + $0x7c] ss:$12 sps:$4 sm:$0xff]  }
   0x8   :  { %644 = vmatprep.subr.bf16.mxu1 %v739_v0  ;;  %158 = vmatprep.subr.bf16.mxu0 %v699_v8  ;;  %v23_v20 = vunpack.c.l.bf16 %v824_v17  ;;  %v718_v26 = vld [vmem:[%s949_s3 + $0x80] ss:$12 sps:$4 sm:$0xff]   ;;  %v715_v27 = vld [vmem:[%s949_s3 + $0x78] ss:$12 sps:$4 sm:$0xff]   ;;  %v722_v29 = vld [vmem:[%s949_s3 + $0x68] ss:$12 sps:$4 sm:$0xff]  }
   0x9   :  { %v721_v28 = vld [vmem:[%s949_s3 + $0x64] ss:$12 sps:$4 sm:$0xff]   ;;  %v719_v30 = vld [vmem:[%s949_s3 + $0x60] ss:$12 sps:$4 sm:$0xff]   ;;  %v723_v33 = vld [vmem:[%s949_s3 + $0x48] ss:$12 sps:$4 sm:$0xff]  }
   0xa   :  { %v24_v22 = vsub.f32 %v21_v15, %v23_v20  ;;  %v726_v32 = vld [vmem:[%s949_s3 + $0x50] ss:$12 sps:$4 sm:$0xff]   ;;  %v729_v34 = vld [vmem:[%s949_s3 + $0x34] ss:$12 sps:$4 sm:$0xff]   ;;  %v730_v35 = vld [vmem:[%s949_s3 + $0x38] ss:$12 sps:$4 sm:$0xff]  }
   0xb   :  { %645 = vmatpush3.bf16.msra.mxu1 %v701_v9  ;;  %159 = vmatpush1.bf16.msra.mxu0 %v702_v10  ;;  %v727_v36 = vld [vmem:[%s949_s3 + $0x30] ss:$12 sps:$4 sm:$0xff]   ;;  %v734_v38 = vld [vmem:[%s949_s3 + $0x20] ss:$12 sps:$4 sm:$0xff]   ;;  %v731_v39 = vld [vmem:[%s949_s3 + $0x18] ss:$12 sps:$4 sm:$0xff]  }
   0xc   :  { %646 = vmatprep.subr.bf16.mxu1 %v739_v0  ;;  %160 = vmatprep.subr.bf16.mxu0 %v703_v11  ;;  %v25_v24 = vpack.c.bf16 %v24_v22, %v24_v22  ;;  %v733_v37 = vld [vmem:[%s949_s3 + $0x1c] ss:$12 sps:$4 sm:$0xff]   ;;  %v737_v40 = vld [vmem:[%s949_s3 + $0x4] ss:$12 sps:$4 sm:$0xff]   ;;  %v735_v42 = vld [vmem:[%s949_s3] ss:$12 sps:$4 sm:$0xff]  }
   0xd   :  { %v738_v41 = vld [vmem:[%s949_s3 + $0x8] ss:$12 sps:$4 sm:$0xff]   ;;  %v536_v61 = vsub.s32 2, %v527_v60  ;;  %v618_v62 = vld [vmem:[%s950_s4 + $0x1] ss:$2 sm:$0x7] }
   0xe   :  { %v528_v63 = vsub.s32 0, %v527_v60  ;;  %v565_v22 = vld [vmem:[%s951_s1 + $0x10] sm:$0xff] }
   0xf   :  { %647 = vmatpush3.bf16.msra.mxu1 %v705_v12  ;;  %161 = vmatpush1.bf16.msra.mxu0 %v706_v13 }
  0x10   :  { %648 = vmatprep.subr.bf16.mxu1 %v739_v0  ;;  %162 = vmatprep.subr.bf16.mxu0 %v707_v14 }
  0x13   :  { %649 = vmatpush3.bf16.msra.mxu1 %v709_v16  ;;  %163 = vmatpush1.bf16.msra.mxu0 %v710_v18 }
  0x14   :  { %650 = vmatprep.subr.bf16.mxu1 %v739_v0  ;;  %164 = vmatprep.subr.bf16.mxu0 %v711_v19 }
  0x17   :  { %651 = vmatpush3.bf16.msra.mxu1 %v713_v21  ;;  %165 = vmatpush1.bf16.msra.mxu0 %v714_v23 }
  0x18   :  { %656 = vmatprep.subr.bf16.mxu1 %v739_v0  ;;  %238 = vmatprep.subr.bf16.mxu0 %v691_v1 }
  0x1a   :  { %653 = vmatmul.mubr.msk.bf16.vlgmr.msra.gmra.mxu1 %vm146_vm1, %v25_v24  ;;  %594 = vmatmul.mubr.msk.bf16.vlgmr.msra.gmra.mxu0 %vm146_vm1, %v25_v24 }
  0x1b   :  { %657 = vmatpush3.bf16.msra.mxu1 %v693_v2  ;;  %239 = vmatpush1.bf16.msra.mxu0 %v694_v4  ;;  %v532_v4 = vsub.s32 1, %v527_v60 }
  0x1c   :  { %658 = vmatprep.subr.bf16.mxu1 %v739_v0  ;;  %240 = vmatprep.subr.bf16.mxu0 %v695_v5 }
  0x1d   :  { %668 = vmatprep.mubr.msk.bf16.mxu1 %vm740_vm0, %v739_v0  ;;  %266 = vmatprep.mubr.bf16.mxu0 %v741_v3 }
  0x1f   :  { %659 = vmatpush3.bf16.msra.mxu1 %v697_v6  ;;  %241 = vmatpush1.bf16.msra.mxu0 %v698_v7  ;;  %v537_v6 = vrot.slane %v618_v62, %v536_v61 }
  0x20   :  { %660 = vmatprep.subr.bf16.mxu1 %v739_v0  ;;  %242 = vmatprep.subr.bf16.mxu0 %v699_v8 }
  0x23   :  { %661 = vmatpush3.bf16.msra.mxu1 %v701_v9  ;;  %243 = vmatpush1.bf16.msra.mxu0 %v702_v10  ;;  %v529_v10 = vrot.slane %v618_v62, %v528_v63 }
  0x24   :  { %662 = vmatprep.subr.bf16.mxu1 %v739_v0  ;;  %244 = vmatprep.subr.bf16.mxu0 %v703_v11 }
  0x27   :  { %663 = vmatpush3.bf16.msra.mxu1 %v705_v12  ;;  %245 = vmatpush1.bf16.msra.mxu0 %v706_v13 }
  0x28   :  { %664 = vmatprep.subr.bf16.mxu1 %v739_v0  ;;  %246 = vmatprep.subr.bf16.mxu0 %v707_v14 }
  0x2b   :  { %665 = vmatpush3.bf16.msra.mxu1 %v709_v16  ;;  %247 = vmatpush1.bf16.msra.mxu0 %v710_v18  ;;  %v533_v18 = vrot.slane %v618_v62, %v532_v4 }
  0x2c   :  { %666 = vmatprep.subr.bf16.mxu1 %v739_v0  ;;  %248 = vmatprep.subr.bf16.mxu0 %v711_v19 }
  0x2f   :  { %667 = vmatpush3.bf16.msra.mxu1 %v713_v21  ;;  %249 = vmatpush1.bf16.msra.mxu0 %v714_v23 }
  0x30   :  { %672 = vmatprep.subr.bf16.mxu1 %v739_v0  ;;  %439 = vmatprep.subr.bf16.mxu0 %v717_v25 }
  0x32   :  { %669 = vmatmul.mubr.msk.bf16.vlgmr.msra.gmra.mxu1 %vm146_vm1, %v824_v17  ;;  %596 = vmatmul.mubr.msk.bf16.vlgmr.msra.gmra.mxu0 %vm146_vm1, %v824_v17 }
  0x33   :  { %673 = vmatpush3.bf16.msra.mxu1 %v718_v26  ;;  %440 = vmatpush1.bf16.msra.mxu0 %v715_v27 }
  0x34   :  { %674 = vmatprep.subr.bf16.mxu1 %v739_v0  ;;  %441 = vmatprep.subr.bf16.mxu0 %v721_v28  ;;  %v563_v28 = vld [vmem:[%s951_s1] sm:$0xff] }
  0x35   :  { %684 = vmatprep.mubr.msk.bf16.mxu1 %vm740_vm0, %v739_v0  ;;  %467 = vmatprep.mubr.bf16.mxu0 %v741_v3  ;;  %v522_v3 = vld [vmem:[%s950_s4] ss:$2 sm:$0x7] }
  0x36   :  { %v556_v13 = vrot.slane %v522_v3, %v536_v61  ;;  %v548_v16 = vrot.slane %v522_v3, %v528_v63  ;;  %v552_v25 = vrot.slane %v522_v3, %v532_v4 }
  0x37   :  { %675 = vmatpush3.bf16.msra.mxu1 %v722_v29  ;;  %442 = vmatpush1.bf16.msra.mxu0 %v719_v30 }
  0x38   :  { %676 = vmatprep.subr.bf16.mxu1 %v739_v0  ;;  %443 = vmatprep.subr.bf16.mxu0 %v725_v31 }
  0x3b   :  { %677 = vmatpush3.bf16.msra.mxu1 %v726_v32  ;;  %444 = vmatpush1.bf16.msra.mxu0 %v723_v33  ;;  %v564_v33 = vld [vmem:[%s951_s1 + $0x8] sm:$0xff] }
  0x3c   :  { %678 = vmatprep.subr.bf16.mxu1 %v739_v0  ;;  %445 = vmatprep.subr.bf16.mxu0 %v729_v34 }
  0x3f   :  { %679 = vmatpush3.bf16.msra.mxu1 %v730_v35  ;;  %446 = vmatpush1.bf16.msra.mxu0 %v727_v36 }
  0x40   :  { %680 = vmatprep.subr.bf16.mxu1 %v739_v0  ;;  %447 = vmatprep.subr.bf16.mxu0 %v733_v37 }
  0x43   :  { %681 = vmatpush3.bf16.msra.mxu1 %v734_v38  ;;  %448 = vmatpush1.bf16.msra.mxu0 %v731_v39 }
  0x44   :  { %682 = vmatprep.subr.bf16.mxu1 %v739_v0  ;;  %449 = vmatprep.subr.bf16.mxu0 %v737_v40 }
  0x47   :  { %683 = vmatpush3.bf16.msra.mxu1 %v738_v41  ;;  %450 = vmatpush1.bf16.msra.mxu0 %v735_v42 }
  0x4a   :  { %685 = vmatmul.mubr.msk.bf16.vlgmr.msra.gmra.mxu1 %vm146_vm1, %v824_v17  ;;  %616 = vmatmul.mubr.msk.bf16.vlgmr.msra.gmra.mxu0 %vm146_vm1, %v824_v17 }
  0xda   :  { %v225_v43 = vpop.f32.mrf.mxu1  ;;  %v184_v44 = vpop.f32.mrf.mxu0 }
  0xdc   :  { %v654_v45 = vpop.f32.mrf.mxu1  ;;  %v186_v46 = vpop.f32.mrf.mxu0 }
  0xde   :  { %v228_v47 = vpop.f32.mrf.mxu1  ;;  %v188_v48 = vpop.f32.mrf.mxu0 }
  0xe0   :  { %v655_v49 = vpop.f32.mrf.mxu1  ;;  %v189_v50 = vpop.f32.mrf.mxu0 }
  0xf2   :  { %v309_v51 = vpop.f32.mrf.mxu1  ;;  %v268_v52 = vpop.f32.mrf.mxu0 }
  0xf3   :  { %v310_v0 = vadd.f32 %v309_v51, %v225_v43  ;;  %v269_v1 = vadd.f32 %v268_v52, %v184_v44 }
  0xf4   :  { %v670_v53 = vpop.f32.mrf.mxu1  ;;  %v270_v54 = vpop.f32.mrf.mxu0 }
  0xf5   :  { %v271_v8 = vadd.f32 %v270_v54, %v186_v46 }
  0xf6   :  { %v312_v55 = vpop.f32.mrf.mxu1  ;;  %v272_v56 = vpop.f32.mrf.mxu0 }
  0xf8   :  { %v671_v57 = vpop.f32.mrf.mxu1  ;;  %v273_v58 = vpop.f32.mrf.mxu0 }
 0x10a   :  { %v510_v2 = vpop.f32.mrf.mxu1  ;;  %v469_v7 = vpop.f32.mrf.mxu0 }
 0x10b   :  { %v518_v5 = vadd.f32 %v510_v2, %v310_v0  ;;  %v516_v9 = vadd.f32 %v469_v7, %v269_v1 }
 0x10c   :  { %v686_v11 = vpop.f32.mrf.mxu1  ;;  %v471_v14 = vpop.f32.mrf.mxu0 }
 0x10d   :  { %v521_v12 = vmax.f32 %v518_v5, 0.0  ;;  %v519_v15 = vmax.f32 %v516_v9, 0.0  ;;  %v517_v17 = vadd.f32 %v471_v14, %v271_v8 }
 0x10e   :  { %v513_v19 = vpop.f32.mrf.mxu1  ;;  %v473_v21 = vpop.f32.mrf.mxu0 }
 0x10f   :  { %v543_v20 = vmul.f32 %v537_v6, %v521_v12  ;;  %v541_v23 = vmul.f32 %v529_v10, %v519_v15  ;;  %v520_v24 = vmax.f32 %v517_v17, 0.0 }
 0x110   :  { %v687_v26 = vpop.f32.mrf.mxu1  ;;  %v474_v29 = vpop.f32.mrf.mxu0 }
 0x111   :  { %v562_v27 = vadd.f32 %v556_v13, %v543_v20  ;;  %v560_v30 = vadd.f32 %v548_v16, %v541_v23  ;;  %v542_v31 = vmul.f32 %v533_v18, %v520_v24 }
 0x113   :  { %v568_v32 = vmul.f32 %v565_v22, %v562_v27  ;;  %v566_v34 = vmul.f32 %v563_v28, %v560_v30  ;;  %v561_v35 = vadd.f32 %v552_v25, %v542_v31 }
 0x115   :  { %571 = vst [vmem:[%s952_s5 + $0x10] sm:$0xff] %v568_v32  ;;  %569 = vst [vmem:[%s952_s5] sm:$0xff] %v566_v34  ;;  %v567_v36 = vmul.f32 %v564_v33, %v561_v35 }
 0x117   :  { %570 = vst [vmem:[%s952_s5 + $0x8] sm:$0xff] %v567_v36 }

</bundles_post_ra>
